<compile_context>
chip_gen: v5e
topology: v5e:2x2
jax: 0.10.0
libtpu: 0.0.40
codegen_flags: <defaults>
</compile_context>

<pallas_src>
import jax
import jax.numpy as jnp
from jax.experimental import pallas as pl
from jax.experimental.pallas import tpu as pltpu

_SQRT_2_OVER_PI = 0.7978845608028654


def _gelu_tanh(v):
    return 0.5 * v * (1.0 + jnp.tanh(_SQRT_2_OVER_PI * (v + 0.044715 * v * v * v)))


def _make_mixer_kernel(residual: bool):
    def kernel(x_ref, w1_ref, w2_ref, t_ref, o_ref):
        # x_ref : [C_in, ts]    f32 activation tile (channels = sublanes,
        #                       flattened spatial = lanes -> lane-dense)
        # w1_ref: [C_out, C_in]  conv1 weight with BN1 scale folded in (bf16)
        # w2_ref: [C_out, C_out] conv2 weight with BN2 scale folded in (bf16)
        # t_ref : [C_out, 2]     folded BN shifts (f32): col 0 -> block1, col 1 -> block2
        x = x_ref[...]

        # Block 1: 1x1 conv as W @ X on the MXU (f32 accumulation) -> +shift -> GELU.
        h = jnp.dot(w1_ref[...], x.astype(w1_ref.dtype),
                    preferred_element_type=jnp.float32)
        h = _gelu_tanh(h + t_ref[:, 0:1])

        # Block 2.
        y = jnp.dot(w2_ref[...], h.astype(w2_ref.dtype),
                    preferred_element_type=jnp.float32)
        y = _gelu_tanh(y + t_ref[:, 1:2])

        if residual:
            y = y + x.astype(jnp.float32)
        o_ref[...] = y.astype(o_ref.dtype)

    return kernel


def fold_batchnorm(gamma, beta, running_mean, running_var, eps=1e-5):
    """Eval-mode BatchNorm2d -> per-channel (scale, shift)."""
    scale = gamma / jnp.sqrt(running_var + eps)
    shift = beta - running_mean * scale
    return scale, shift


def prep_params(w1, scale1, shift1, w2, scale2, shift2, weight_dtype=jnp.bfloat16):
    """Fold BN scales into the conv weights (in f32, BEFORE any bf16 cast) and
    pack the two BN shift vectors into one resident (C_out, 2) operand."""
    w1_eff = (w1.astype(jnp.float32) * scale1.astype(jnp.float32)[:, None]).astype(weight_dtype)
    w2_eff = (w2.astype(jnp.float32) * scale2.astype(jnp.float32)[:, None]).astype(weight_dtype)
    shifts = jnp.stack([shift1, shift2], axis=-1).astype(jnp.float32)  # [C_out, 2]
    return w1_eff, w2_eff, shifts


def _pick_spatial_tile(n_sp, ts_target):
    """Lane-dense spatial tile: a multiple of 128, or the full extent if small."""
    if n_sp <= ts_target or n_sp < 128:
        return n_sp
    return max(128, (ts_target // 128) * 128)


def pointwise_mixer(x, w1_eff, w2_eff, shifts, *, ts_target=2048,
                    vmem_limit_bytes=48 * 1024 * 1024):
    """PointwiseMixer forward (eval mode, BN folded).

    x       : [B, C_in, H, W]   float32, native NCHW layout (no transpose needed)
    w1_eff  : [C_out, C_in]     conv1 weight * BN1 scale (bf16 or f32)
    w2_eff  : [C_out, C_out]    conv2 weight * BN2 scale (bf16 or f32)
    shifts  : [C_out, 2]        folded BN shifts (f32)
    returns : [B, C_out, H, W]
    """
    B, C_in, H, W = x.shape
    C_out = w1_eff.shape[0]
    residual = (C_in == C_out)
    n_sp = H * W

    # Free reshape: collapse contiguous trailing dims, no HBM copy / transpose.
    x3 = x.reshape(B, C_in, n_sp)

    ts = _pick_spatial_tile(n_sp, ts_target)
    grid = (B, pl.cdiv(n_sp, ts))

    cost = pl.CostEstimate(
        flops=2 * B * n_sp * (C_in * C_out + C_out * C_out),
        transcendentals=2 * B * n_sp * C_out,
        bytes_accessed=(x3.size * x3.dtype.itemsize
                        + w1_eff.size * w1_eff.dtype.itemsize
                        + w2_eff.size * w2_eff.dtype.itemsize
                        + shifts.size * shifts.dtype.itemsize
                        + B * C_out * n_sp * x.dtype.itemsize),
    )

    out3 = pl.pallas_call(
        _make_mixer_kernel(residual),
        out_shape=jax.ShapeDtypeStruct((B, C_out, n_sp), x.dtype),
        grid_spec=pltpu.PrefetchScalarGridSpec(
            num_scalar_prefetch=0,
            grid=grid,
            in_specs=[
                # Activation tile (batch dim squeezed): [C_in, ts], pipelined.
                pl.BlockSpec((None, C_in, ts), lambda b, s: (b, 0, s)),
                pl.BlockSpec((C_out, C_in), lambda b, s: (0, 0)),    # W1*s1 (resident)
                pl.BlockSpec((C_out, C_out), lambda b, s: (0, 0)),   # W2*s2 (resident)
                pl.BlockSpec((C_out, 2), lambda b, s: (0, 0)),       # BN shifts (resident)
            ],
            out_specs=pl.BlockSpec((None, C_out, ts), lambda b, s: (b, 0, s)),
        ),
        compiler_params=pltpu.CompilerParams(
            # Batch and spatial tiles are independent -> "parallel" lets v7x
            # shard the grid across its two TensorCores; harmless on v5e/v6e.
            dimension_semantics=("parallel", "parallel"),
            # Above the 16/32 MiB scoped defaults, below v7x's 64 MiB physical.
            vmem_limit_bytes=vmem_limit_bytes,
        ),
        cost_estimate=cost,
    )(x3, w1_eff, w2_eff, shifts)

    return out3.reshape(B, C_out, H, W)


def _reference_matched(x, w1_eff, w2_eff, shifts):
    """Pure-JAX reference with the kernel's exact numerics (bf16 MXU operands,
    f32 accumulation, folded BN, tanh GELU)."""
    B, C_in, H, W = x.shape
    C_out = w1_eff.shape[0]
    x3 = x.reshape(B, C_in, H * W)
    h = jnp.einsum('oc,bcs->bos', w1_eff, x3.astype(w1_eff.dtype),
                   preferred_element_type=jnp.float32)
    h = _gelu_tanh(h + shifts[None, :, 0:1])
    y = jnp.einsum('oc,bcs->bos', w2_eff, h.astype(w2_eff.dtype),
                   preferred_element_type=jnp.float32)
    y = _gelu_tanh(y + shifts[None, :, 1:2])
    if C_in == C_out:
        y = y + x3.astype(jnp.float32)
    return y.reshape(B, C_out, H, W).astype(x.dtype)


def _reference_torch_semantics(x, w1, w2, bn1, bn2, eps=1e-5):
    """PyTorch-default semantics: f32 1x1 conv, unfolded eval-mode BN, exact erf GELU."""
    g1, b1, rm1, rv1 = bn1
    g2, b2, rm2, rv2 = bn2
    B, C_in, H, W = x.shape
    C_out = w1.shape[0]
    x3 = x.reshape(B, C_in, H * W)

    def block(v, w, g, b, rm, rv):
        h = jnp.einsum('oc,bcs->bos', w, v)
        h = (h - rm[None, :, None]) * (g / jnp.sqrt(rv + eps))[None, :, None] + b[None, :, None]
        return jax.nn.gelu(h, approximate=False)

    h = block(x3, w1, g1, b1, rm1, rv1)
    y = block(h, w2, g2, b2, rm2, rv2)
    if C_in == C_out:
        y = y + x3
    return y.reshape(B, C_out, H, W)


if __name__ == "__main__":
    key = jax.random.PRNGKey(0)
    keys = jax.random.split(key, 11)

    # Small test shape; in_ch == out_ch so the residual path is exercised.
    batch, in_ch, out_ch, spatial = 2, 32, 32, 16
    x = jax.random.normal(keys[0], (batch, in_ch, spatial, spatial), dtype=jnp.float32)

    # Conv weights (PyTorch layout [out, in] for a 1x1 kernel) + eval-mode BN stats.
    w1 = jax.random.normal(keys[1], (out_ch, in_ch), dtype=jnp.float32) * 0.1
    w2 = jax.random.normal(keys[2], (out_ch, out_ch), dtype=jnp.float32) * 0.1
    g1 = 1.0 + 0.1 * jax.random.normal(keys[3], (out_ch,), dtype=jnp.float32)
    b1 = 0.1 * jax.random.normal(keys[4], (out_ch,), dtype=jnp.float32)
    rm1 = 0.1 * jax.random.normal(keys[5], (out_ch,), dtype=jnp.float32)
    rv1 = 0.5 + jnp.abs(jax.random.normal(keys[6], (out_ch,), dtype=jnp.float32))
    g2 = 1.0 + 0.1 * jax.random.normal(keys[7], (out_ch,), dtype=jnp.float32)
    b2 = 0.1 * jax.random.normal(keys[8], (out_ch,), dtype=jnp.float32)
    rm2 = 0.1 * jax.random.normal(keys[9], (out_ch,), dtype=jnp.float32)
    rv2 = 0.5 + jnp.abs(jax.random.normal(keys[10], (out_ch,), dtype=jnp.float32))

    s1, t1 = fold_batchnorm(g1, b1, rm1, rv1)
    s2, t2 = fold_batchnorm(g2, b2, rm2, rv2)
    w1_eff, w2_eff, shifts = prep_params(w1, s1, t1, w2, s2, t2,
                                         weight_dtype=jnp.bfloat16)

    # ts_target=128 just to exercise the multi-tile spatial grid at this tiny
    # size (H*W = 256 -> grid (2, 2)); production default is ts_target=2048.
    out = pointwise_mixer(x, w1_eff, w2_eff, shifts, ts_target=128)
    jax.block_until_ready(out)
    assert out.shape == (batch, out_ch, spatial, spatial)

    # 1) Strict check vs a pure-JAX reference using the kernel's exact numerics.
    ref = _reference_matched(x, w1_eff, w2_eff, shifts)
    err = float(jnp.max(jnp.abs(out - ref)))
    assert jnp.allclose(out, ref, atol=1e-4, rtol=1e-4), \
        f"mismatch vs matched reference, max abs err={err}"

    # 2) Fidelity check vs PyTorch-default semantics (f32 conv, unfolded BN,
    #    exact erf GELU); loose tolerance covers bf16 weights + tanh GELU.
    ref_pt = _reference_torch_semantics(x, w1, w2,
                                        (g1, b1, rm1, rv1), (g2, b2, rm2, rv2))
    err_pt = float(jnp.max(jnp.abs(out - ref_pt)))
    assert jnp.allclose(out, ref_pt, atol=5e-2), \
        f"mismatch vs PyTorch-semantics reference, max abs err={err_pt}"

    print("KERNEL_OK")
</pallas_src>

<mosaic_0001>
module attributes {stable_mosaic.version = 11 : i64} {
  func.func @kernel(%arg0: i32, %arg1: i32, %arg2: memref<1x32x128xf32, #tpu.memory_space<vmem>>, %arg3: memref<32x32xbf16, #tpu.memory_space<vmem>>, %arg4: memref<32x32xbf16, #tpu.memory_space<vmem>>, %arg5: memref<32x2xf32, #tpu.memory_space<vmem>>, %arg6: memref<1x32x128xf32, #tpu.memory_space<vmem>>) attributes {dimension_semantics = [#tpu.dimension_semantics<parallel>, #tpu.dimension_semantics<parallel>], iteration_bounds = array<i64: 2, 2>, scalar_prefetch = 0 : i64, scratch_operands = 0 : i64, tpu.core_type = #tpu.core_type<tc>, window_params = [{transform_indices = @transform_0, window_bounds = array<i64: 1, 32, 128>}, {pipeline_mode = #tpu.pipeline_mode<synchronous>, transform_indices = @transform_1, window_bounds = array<i64: 32, 32>}, {pipeline_mode = #tpu.pipeline_mode<synchronous>, transform_indices = @transform_2, window_bounds = array<i64: 32, 32>}, {pipeline_mode = #tpu.pipeline_mode<synchronous>, transform_indices = @transform_3, window_bounds = array<i64: 32, 2>}, {transform_indices = @transform_4, window_bounds = array<i64: 1, 32, 128>}]} {
    %c0 = arith.constant 0 : index
    %c0_0 = arith.constant 0 : index
    %c0_1 = arith.constant 0 : index
    %0 = vector.load %arg2[%c0, %c0_0, %c0_1] : memref<1x32x128xf32, #tpu.memory_space<vmem>>, vector<1x32x128xf32>
    %1 = vector.shape_cast %0 : vector<1x32x128xf32> to vector<32x128xf32>
    %c0_2 = arith.constant 0 : index
    %c0_3 = arith.constant 0 : index
    %2 = vector.load %arg3[%c0_2, %c0_3] : memref<32x32xbf16, #tpu.memory_space<vmem>>, vector<32x32xbf16>
    %3 = arith.truncf %1 : vector<32x128xf32> to vector<32x128xbf16>
    %cst = arith.constant dense<0.000000e+00> : vector<32x128xf32>
    %4 = tpu.matmul %2, %3, %cst {dimension_numbers = #tpu.dot_dimension_numbers<[1], [0], [0], [1], [0, 0, 1, 1], [], []>} : vector<32x32xbf16>, vector<32x128xbf16>, vector<32x128xf32> -> vector<32x128xf32>
    %c0_4 = arith.constant 0 : index
    %c0_5 = arith.constant 0 : index
    %5 = vector.load %arg5[%c0_4, %c0_5] : memref<32x2xf32, #tpu.memory_space<vmem>>, vector<32x1xf32>
    %6 = vector.broadcast %5 : vector<32x1xf32> to vector<32x128xf32>
    %7 = arith.addf %4, %6 : vector<32x128xf32>
    %cst_6 = arith.constant 5.000000e-01 : f32
    %8 = vector.broadcast %cst_6 : f32 to vector<32x128xf32>
    %9 = arith.mulf %8, %7 : vector<32x128xf32>
    %cst_7 = arith.constant 4.471500e-02 : f32
    %10 = vector.broadcast %cst_7 : f32 to vector<32x128xf32>
    %11 = arith.mulf %10, %7 : vector<32x128xf32>
    %12 = arith.mulf %11, %7 : vector<32x128xf32>
    %13 = arith.mulf %12, %7 : vector<32x128xf32>
    %14 = arith.addf %7, %13 : vector<32x128xf32>
    %cst_8 = arith.constant 0.797884583 : f32
    %15 = vector.broadcast %cst_8 : f32 to vector<32x128xf32>
    %16 = arith.mulf %15, %14 : vector<32x128xf32>
    %17 = math.tanh %16 : vector<32x128xf32>
    %cst_9 = arith.constant 1.000000e+00 : f32
    %18 = vector.broadcast %cst_9 : f32 to vector<32x128xf32>
    %19 = arith.addf %18, %17 : vector<32x128xf32>
    %20 = arith.mulf %9, %19 : vector<32x128xf32>
    %c0_10 = arith.constant 0 : index
    %c0_11 = arith.constant 0 : index
    %21 = vector.load %arg4[%c0_10, %c0_11] : memref<32x32xbf16, #tpu.memory_space<vmem>>, vector<32x32xbf16>
    %22 = arith.truncf %20 : vector<32x128xf32> to vector<32x128xbf16>
    %cst_12 = arith.constant dense<0.000000e+00> : vector<32x128xf32>
    %23 = tpu.matmul %21, %22, %cst_12 {dimension_numbers = #tpu.dot_dimension_numbers<[1], [0], [0], [1], [0, 0, 1, 1], [], []>} : vector<32x32xbf16>, vector<32x128xbf16>, vector<32x128xf32> -> vector<32x128xf32>
    %c0_13 = arith.constant 0 : index
    %c1 = arith.constant 1 : index
    %24 = vector.load %arg5[%c0_13, %c1] : memref<32x2xf32, #tpu.memory_space<vmem>>, vector<32x1xf32>
    %25 = vector.broadcast %24 : vector<32x1xf32> to vector<32x128xf32>
    %26 = arith.addf %23, %25 : vector<32x128xf32>
    %cst_14 = arith.constant 5.000000e-01 : f32
    %27 = vector.broadcast %cst_14 : f32 to vector<32x128xf32>
    %28 = arith.mulf %27, %26 : vector<32x128xf32>
    %cst_15 = arith.constant 4.471500e-02 : f32
    %29 = vector.broadcast %cst_15 : f32 to vector<32x128xf32>
    %30 = arith.mulf %29, %26 : vector<32x128xf32>
    %31 = arith.mulf %30, %26 : vector<32x128xf32>
    %32 = arith.mulf %31, %26 : vector<32x128xf32>
    %33 = arith.addf %26, %32 : vector<32x128xf32>
    %cst_16 = arith.constant 0.797884583 : f32
    %34 = vector.broadcast %cst_16 : f32 to vector<32x128xf32>
    %35 = arith.mulf %34, %33 : vector<32x128xf32>
    %36 = math.tanh %35 : vector<32x128xf32>
    %cst_17 = arith.constant 1.000000e+00 : f32
    %37 = vector.broadcast %cst_17 : f32 to vector<32x128xf32>
    %38 = arith.addf %37, %36 : vector<32x128xf32>
    %39 = arith.mulf %28, %38 : vector<32x128xf32>
    %40 = arith.addf %39, %1 : vector<32x128xf32>
    %c0_18 = arith.constant 0 : index
    %c0_19 = arith.constant 0 : index
    %c0_20 = arith.constant 0 : index
    %41 = vector.load %arg6[%c0_18, %c0_19, %c0_20] : memref<1x32x128xf32, #tpu.memory_space<vmem>>, vector<1x32x128xf32>
    %42 = vector.shape_cast %41 : vector<1x32x128xf32> to vector<32x128xf32>
    %43 = vector.shape_cast %40 : vector<32x128xf32> to vector<1x32x128xf32>
    tpu.vector_store %arg6[%c0_18, %c0_19, %c0_20], %43 {strides = array<i32>} : memref<1x32x128xf32, #tpu.memory_space<vmem>>, vector<1x32x128xf32>,
    return
  }
  func.func @transform_0(%arg0: i32, %arg1: i32) -> (i32, i32, i32) {
    %c0_i32 = arith.constant 0 : i32
    %c0_i32_0 = arith.constant 0 : i32
    return %arg0, %c0_i32, %arg1 : i32, i32, i32
  }
  func.func @transform_1(%arg0: i32, %arg1: i32) -> (i32, i32) {
    %c0_i32 = arith.constant 0 : i32
    %c0_i32_0 = arith.constant 0 : i32
    %c0_i32_1 = arith.constant 0 : i32
    return %c0_i32, %c0_i32_0 : i32, i32
  }
  func.func @transform_2(%arg0: i32, %arg1: i32) -> (i32, i32) {
    %c0_i32 = arith.constant 0 : i32
    %c0_i32_0 = arith.constant 0 : i32
    %c0_i32_1 = arith.constant 0 : i32
    return %c0_i32, %c0_i32_0 : i32, i32
  }
  func.func @transform_3(%arg0: i32, %arg1: i32) -> (i32, i32) {
    %c0_i32 = arith.constant 0 : i32
    %c0_i32_0 = arith.constant 0 : i32
    %c0_i32_1 = arith.constant 0 : i32
    return %c0_i32, %c0_i32_0 : i32, i32
  }
  func.func @transform_4(%arg0: i32, %arg1: i32) -> (i32, i32, i32) {
    %c0_i32 = arith.constant 0 : i32
    %c0_i32_0 = arith.constant 0 : i32
    return %arg0, %c0_i32, %arg1 : i32, i32, i32
  }
}

</mosaic_0001>

<bundles_post_ra>
// kernel: tpu_custom_call.1
= control target key start
LH: loop header
LB: loop body
LE: loop exit
PB: predicated region body
PF: predicated region fallthrough
CT: control target
= control target key end

     0   :  { %9 = vsyncpa [#allocation3], 0  ;;  %s1051_s0 = inlined_call_operand.hbm [shape: f32[2,32,256], index: 0, kind: input, shape index: {}]   ;;  %s1052_s1 = inlined_call_operand.vmem [shape: bf16[32,32], index: 1, kind: input, shape index: {}]   ;;  %s1053_s2 = inlined_call_operand.vmem [shape: bf16[32,32], index: 2, kind: input, shape index: {}]   ;;  %s1054_s3 = inlined_call_operand.vmem [shape: f32[32,2], index: 3, kind: input, shape index: {}]   ;;  %s1055_s4 = inlined_call_operand.hbm [shape: f32[2,32,256], index: 4, kind: output, shape index: {}]  }
   0x1   :  { %11 = vsyncpa [#allocation3 + $0x1], 0 }
   0x2   :  { %12 = vsyncpa [#allocation4], 0 }
   0x3   :  { %14 = vsyncpa [#allocation4 + $0x1], 0  ;;  %s861_s15 = smov 0   ;;  %s863_s16 = smov 0  }
   0x4   :  { %s865_s17 = smov 0   ;;  %s867_s18 = smov 0  }
   0x5   :  { %s869_s19 = smov 0   ;;  %s871_s20 = smov 0  }
   0x6   :  { %s873_s21 = smov 0   ;;  %s875_s22 = smov 0  }
   0x7 LB: > { %1059 = sst [smem:[#allocation8_spill]] %s806_s17  ;;  %s548_s23 = sadd.s32 4294967295, %s826_s22   ;;  %s826_s22 = sphi %s875_s22, %s20_s22   ;;  %s822_s21 = sphi %s873_s21, %s1076_s21   ;;  %s818_s20 = sphi %s871_s20, %s1075_s20   ;;  %s814_s19 = sphi %s869_s19, %s1074_s19   ;;  %s810_s18 = sphi %s867_s18, %s1073_s18   ;;  %s806_s17 = sphi %s865_s17, %s1068_s17   ;;  %s802_s16 = sphi %s863_s16, %s1072_s16   ;;  %s798_s15 = sphi %s861_s15, %s1071_s15  }
   0x8   : > { %s549_s24 = sadd.s32 4294967294, %s826_s22   ;;  %s29_s25 = sadd.s32 1, %s818_s20 }
   0x9   : > { %s32_s26 = sadd.s32 1, %s822_s21  ;;  %p30_p0 = scmp.ge.s32.totalorder %s29_s25, 2 }
   0xa   : > { %s41_s27 = sadd.s32 1, %s806_s17  ;;  %p48_p1 = scmp.ne.s32.totalorder %s806_s17, %s802_s16 }
   0xb   : > { %p49_p2 = scmp.eq.s32.totalorder %s826_s22, 0  ;;  %s1078_s25 = smov (%p30_p0, %s29_s25), 0 }
   0xc   : > { %1060 = sst [smem:[#allocation9_spill]] %s1078_s25  ;;  %s1080_s26 = smov (!%p30_p0, %s32_s26), %s822_s21 }
   0xd   : > { %s37_s28 = ssub.s32 %s818_s20, %s1078_s25  ;;  %p914_p3 = por %p49_p2, %p48_p1 }
   0xe   : > { %p34_p4 = scmp.ge.s32.totalorder %s1080_s26, 2  ;;  %p54_p5 = scmp.ne.s32.totalorder %s802_s16, %s798_s15 }
   0xf   : > { %p55_p6 = scmp.eq.s32.totalorder %s548_s23, 0  ;;  %p143_p7 = scmp.eq.s32.totalorder %s548_s23, 3 }
  0x10   : > { %s1082_s26 = smov (%p34_p4, %s1080_s26), 0  ;;  %p149_p10 = scmp.eq.s32.totalorder %s549_s24, 3 }
  0x11   : > { %1062 = sst [smem:[#allocation10_spill]] %s1082_s26  ;;  %p922_p8 = por %p55_p6, %p54_p5 }
  0x12   : > { %p926_p9 = por %p143_p7, %p48_p1  ;;  %s36_s6 = ssub.s32 %s822_s21, %s1082_s26 }
  0x13   : > { %s38_s7 = sor.u32 %s37_s28, %s36_s6  ;;  %p932_p12 = por %p149_p10, %p54_p5 }
  0x14   : > { %p39_p11 = scmp.eq.s32.totalorder %s38_s7, 0  ;;  %p603_p13 = scmp.lt.s32.totalorder %s826_s22, 4 }
  0x15   : > { %s178_s9 = sand.u32 1, %s806_s17   ;;  %s553_s12 = sshll.u32 %s822_s21, 3 }
  0x16   : > { %s939_s10 = scalar_select %p39_p11, %s806_s17, %s41_s27  }
  0x17   : > { %s552_s11 = sshll.u32 %s178_s9, 5  ;;  %s186_s13 = sadd.s32 %s818_s20, %s553_s12 }
  0x18   : > { %1066 = sst [smem:[#allocation11_spill]] %s939_s10  ;;  %s182_s14 = scalar_lea.vmem [#allocation2], %s552_s11 }
  0x19   : > { %s191_s23 = sshll.u32 %s182_s14, 4  ;;  %s554_s26 = sshll.u32 %s186_s13, 3  ;;  %s192_s23 = int_to_ptr.vmem [resolvable:$true] %s191_s23 }
  0x1a   : > { %s188_s6 = scalar_lea.hbm %s1051_s0, %s554_s26  ;;  %p596_p0 = pnand %p603_p13, %p914_p3 }
  0x1b   : > { %s189_s7 = sshll.u32 %s188_s6, 4  ;;  %s179_s25 = scalar_lea.sflag [#allocation3], %s178_s9  ;;  %s190_s7 = int_to_ptr.hbm [resolvable:$true] %s189_s7 }
  0x1c   : > { %s828_s27 = smov 256   ;;  %s829_s10 = smov 128  }
  0x1d   : > { %s830_s17 = smov 8   ;;  %p555_p1 = scmp.ge.s32.totalorder %s826_s22, 1 }
  0x1e   : > { %598 = dma.hbm_to_vmem [thread:$0]  (!%p596_p0), %s190_s7, 512, %s192_s23, %s179_s25, %s828_s27, %s829_s10, %s830_s17  }
  0x1f   : > { %p199_p2 = scmp.lt.s32.totalorder %s826_s22, 5 }
  0x21   : > { %p200_p4 = pnand %p555_p1, %p199_p2 }
  0x22   : > { %s951_s11 = sand.u32 (!%p200_p4), 1, %s802_s16  }
  0x23   : > { %203 = sbr.rel (%p200_p4) target bundleno = 393 (0x189), region = 36  ;;  %s556_s26 = sshll.u32 (!%p200_p4), %s951_s11, 5 }
  0x24   : > { %s206_s29 = scalar_lea.sflag (!%p200_p4), [#allocation3], %s951_s11  ;;  %s209_s12 = scalar_lea.vmem (!%p200_p4), [#allocation2], %s556_s26 }
  0x28   : > { %789 = dma.done.wait (%p922_p8), %s206_s29, 512  }
  0x29   : > { %791 = vsyncadd (%p922_p8), %s206_s29, 4294966784  ;;  %v831_v0 = vmov 0   ;;  %v961_v1 = vld [vmem:[%s209_s12 + $0x10] sm:$0xff]  ;;  %v963_v2 = vld [vmem:[%s209_s12 + $0x18] sm:$0xff]  ;;  %vm280_vm0 = vcmask 261120   ;;  %v832_v35 = vmov 1  }
  0x2a   : > { %677 = vset.pattern.permute.xlu0 %v831_v0  ;;  %678 = vset.pattern.permute.xlu1 %v831_v0  ;;  %v965_v3 = vld [vmem:[%s209_s12] sm:$0xff]  ;;  %v245_v4 = vpack.c.bf16 %v963_v2, %v961_v1  ;;  %v969_v5 = vld [vmem:[%s209_s12 + $0x8] sm:$0xff]  ;;  %v248_v6 = vld [vmem:[%s1054_s3 + $0x10] sm:$0xff]  ;;  %s579_s25 = sshll.u32 %s814_s19, 3  ;;  %s234_s9 = scalar_lea.vmem [#allocation5], %s556_s26 }
  0x2b   : > { %v246_v7 = vld [vmem:[%s1054_s3] sm:$0xff]  ;;  %v244_v8 = vpack.c.bf16 %v969_v5, %v965_v3  ;;  %262 = vperm.xlu0 %677, %v248_v6   ;;  %v584_v10 = vld [vmem:[%s1052_s1 + $0x8] sm:$0xff]  ;;  %v249_v11 = vld [vmem:[%s1054_s3 + $0x18] sm:$0xff]  ;;  %679 = vset.pattern.permute.xlu2 %v832_v35  ;;  %s454_s30 = sadd.s32 %s810_s18, %s579_s25  ;;  %s457_s18 = sshll.u32 %s234_s9, 4  ;;  %s458_s18 = int_to_ptr.vmem [resolvable:$true] %s457_s18 }
  0x2c   : > { %293 = vmatpush.bf16.msra.mxu0 %v245_v4  ;;  %587 = vmatpush.bf16.msra.mxu2 %v245_v4  ;;  %v583_v9 = vld [vmem:[%s1052_s1] sm:$0xff]  ;;  %v247_v12 = vld [vmem:[%s1054_s3 + $0x8] sm:$0xff]  ;;  %s580_s10 = sshll.u32 %s454_s30, 3  ;;  %s444_s23 = scalar_lea.sflag [#allocation4], %s951_s11 }
  0x2d   : > { %252 = vperm.xlu1 %678, %v246_v7   ;;  %349 = vperm.xlu2 %679, %v246_v7   ;;  %v585_v0 = vld [vmem:[%s1053_s2] sm:$0xff]  ;;  %v586_v4 = vld [vmem:[%s1053_s2 + $0x8] sm:$0xff]  ;;  %s456_s14 = scalar_lea.hbm %s1055_s4, %s580_s10  ;;  %s748_s27 = scalar_lea.hbm %s1055_s4, 128 }
  0x2e   : > { %s459_s26 = sshll.u32 %s456_s14, 4  ;;  %s460_s26 = int_to_ptr.hbm [resolvable:$true] %s459_s26 }
  0x2f   : > { %s742_s24 = sshra.s32 %s460_s26, 4  ;;  %s743_s24 = int_to_ptr.hbm [resolvable:$true] %s742_s24 }
  0x30   : > { %294 = vmatpush.bf16.msra.mxu0 %v244_v8  ;;  %588 = vmatpush.bf16.msra.mxu2 %v244_v8  ;;  %s744_s28 = scalar_lea.hbm %s743_s24, 32  ;;  %p749_p7 = scmp.lt.s32.totalorder %s743_s24, %s1055_s4 }
  0x31   : > { %p745_p3 = scmp.ne.s32.totalorder %s743_s24, %s744_s28  ;;  %p750_p8 = scmp.lt.s32.totalorder %s748_s27, %s744_s28 }
  0x33   : > { %566 = vmatmul.msk.bf16.vlgmr.msra.gmra.mxu0 %vm280_vm0, %v583_v9  ;;  %567 = vmatmul.msk.bf16.vlgmr.msra.gmra.mxu2 %vm280_vm0, %v584_v10  ;;  %p746_p5 = pnand %p745_p3, %p926_p9  ;;  %p751_p10 = por %p750_p8, %p749_p7 }
  0x34   : > { %267 = vperm.xlu0 %677, %v249_v11  }
  0x35   : > { %257 = vperm.xlu1 %678, %v247_v12   ;;  %353 = vperm.xlu2 %679, %v247_v12   ;;  %p747_p6 = pneg %p746_p5 }
  0x37   : > { %p752_p11 = pnand %p751_p10, %p747_p6 }
  0x3c   : > { %680 = vset.pattern.permute.xlu0 %v832_v35 }
  0x3d   : > { %681 = vset.pattern.permute.xlu1 %v832_v35  ;;  %357 = vperm.xlu0 %680, %v248_v6  }
  0x3e   : > { %361 = vperm.xlu1 %681, %v249_v11  }
  0x87   : > { %v350_v6 = vpop.permute.xlu2 %349 }
  0x9d   : > { %v263_v16 = vpop.permute.xlu0 %262 }
  0x9f   : > { %v253_v13 = vpop.permute.xlu1 %252 }
  0xa6   : > { %v268_v29 = vpop.permute.xlu0 %267 }
  0xa7   : > { %v258_v19 = vpop.permute.xlu1 %257 }
  0xaf   : > { %v358_v10 = vpop.permute.xlu0 %357 }
  0xb0   : > { %v296_v14 = vpop.f32.mrf.mxu0 }
  0xb1   : > { %v297_v15 = vadd.f32 %v296_v14, %v253_v13 }
  0xb3   : > { %v310_v17 = vmul.f32 0.044715, %v297_v15  ;;  %v306_v60 = vmul.f32 0.5, %v297_v15 }
  0xb5   : > { %v314_v24 = vmul.f32 %v310_v17, %v297_v15 }
  0xb6   : > { %v301_v18 = vpop.f32.mrf.mxu2 }
  0xb7   : > { %v302_v20 = vadd.f32 %v301_v18, %v263_v16  ;;  %v318_v31 = vmul.f32 %v314_v24, %v297_v15 }
  0xb8   : > { %v298_v21 = vpop.f32.mrf.mxu0 }
  0xb9   : > { %v312_v22 = vmul.f32 0.044715, %v302_v20  ;;  %v299_v23 = vadd.f32 %v298_v21, %v258_v19  ;;  %v322_v38 = vadd.f32 %v318_v31, %v297_v15  ;;  %v308_v51 = vmul.f32 0.5, %v302_v20  ;;  %v354_v15 = vpop.permute.xlu2 %353 }
  0xbb   : > { %v311_v25 = vmul.f32 0.044715, %v299_v23  ;;  %v316_v26 = vmul.f32 %v312_v22, %v302_v20  ;;  %v326_v43 = vmul.f32 0.7978846, %v322_v38  ;;  %v307_v57 = vmul.f32 0.5, %v299_v23 }
  0xbd   : > { %v320_v27 = vmul.f32 %v316_v26, %v302_v20  ;;  %v315_v28 = vmul.f32 %v311_v25, %v299_v23 }
  0xbe   : > { %v303_v30 = vpop.f32.mrf.mxu2 }
  0xbf   : > { %v304_v32 = vadd.f32 %v303_v30, %v268_v29  ;;  %v324_v33 = vadd.f32 %v320_v27, %v302_v20  ;;  %v319_v34 = vmul.f32 %v315_v28, %v299_v23 }
  0xc1   : > { %v313_v36 = vmul.f32 0.044715, %v304_v32  ;;  %v323_v37 = vadd.f32 %v319_v34, %v299_v23  ;;  %v328_v40 = vmul.f32 0.7978846, %v324_v33  ;;  %v309_v52 = vmul.f32 0.5, %v304_v32  ;;  %v362_v23 = vpop.permute.xlu1 %361 }
  0xc3   : > { %v317_v39 = vmul.f32 %v313_v36, %v304_v32  ;;  %v327_v42 = vmul.f32 0.7978846, %v323_v37  ;;  %682 = vtanh.f32 %v328_v40 }
  0xc5   : > { %v321_v41 = vmul.f32 %v317_v39, %v304_v32  ;;  %684 = vtanh.f32 %v327_v42 }
  0xc6   : > { %686 = vtanh.f32 %v326_v43 }
  0xc7   : > { %v325_v44 = vadd.f32 %v321_v41, %v304_v32 }
  0xc9   : > { %v329_v45 = vmul.f32 0.7978846, %v325_v44  ;;  %v683_v46 = vpop.eup %682 }
  0xca   : > { %v336_v49 = vadd.f32 1.0, %v683_v46 }
  0xcb   : > { %688 = vtanh.f32 %v329_v45  ;;  %v685_v47 = vpop.eup %684 }
  0xcc   : > { %v687_v48 = vpop.eup %686  ;;  %v335_v54 = vadd.f32 1.0, %v685_v47  ;;  %v340_v55 = vmul.f32 %v336_v49, %v308_v51 }
  0xcd   : > { %v334_v58 = vadd.f32 1.0, %v687_v48 }
  0xce   : > { %v339_v61 = vmul.f32 %v335_v54, %v307_v57 }
  0xcf   : > { %v338_v62 = vmul.f32 %v334_v58, %v306_v60 }
  0xd1   : > { %v689_v50 = vpop.eup %688  ;;  %v346_v63 = vpack.c.bf16 %v339_v61, %v338_v62 }
  0xd2   : > { %v337_v53 = vadd.f32 1.0, %v689_v50 }
  0xd4   : > { %v341_v56 = vmul.f32 %v337_v53, %v309_v52 }
  0xd6   : > { %v347_v59 = vpack.c.bf16 %v341_v56, %v340_v55 }
  0xd8   : > { %386 = vmatpush.bf16.msra.mxu1 %v347_v59  ;;  %589 = vmatpush.bf16.msra.mxu3 %v347_v59 }
  0xdc   : > { %387 = vmatpush.bf16.msra.mxu1 %v346_v63  ;;  %590 = vmatpush.bf16.msra.mxu3 %v346_v63 }
  0xdf   : > { %576 = vmatmul.msk.bf16.vlgmr.msra.gmra.mxu1 %vm280_vm0, %v585_v0  ;;  %577 = vmatmul.msk.bf16.vlgmr.msra.gmra.mxu3 %vm280_vm0, %v586_v4 }
 0x15c   : > { %v389_v7 = vpop.f32.mrf.mxu1 }
 0x15d   : > { %v390_v8 = vadd.f32 %v389_v7, %v350_v6 }
 0x15f   : > { %v403_v9 = vmul.f32 0.044715, %v390_v8  ;;  %v399_v36 = vmul.f32 0.5, %v390_v8 }
 0x161   : > { %v407_v11 = vmul.f32 %v403_v9, %v390_v8 }
 0x162   : > { %v394_v12 = vpop.f32.mrf.mxu3 }
 0x163   : > { %v411_v13 = vmul.f32 %v407_v11, %v390_v8  ;;  %v395_v14 = vadd.f32 %v394_v12, %v358_v10 }
 0x164   : > { %v391_v16 = vpop.f32.mrf.mxu1 }
 0x165   : > { %v415_v17 = vadd.f32 %v411_v13, %v390_v8  ;;  %v405_v18 = vmul.f32 0.044715, %v395_v14  ;;  %v392_v19 = vadd.f32 %v391_v16, %v354_v15  ;;  %v401_v44 = vmul.f32 0.5, %v395_v14 }
 0x167   : > { %v419_v20 = vmul.f32 0.7978846, %v415_v17  ;;  %v409_v21 = vmul.f32 %v405_v18, %v395_v14  ;;  %v404_v22 = vmul.f32 0.044715, %v392_v19  ;;  %v400_v48 = vmul.f32 0.5, %v392_v19 }
 0x169   : > { %690 = vtanh.f32 %v419_v20  ;;  %v413_v24 = vmul.f32 %v409_v21, %v395_v14  ;;  %v408_v25 = vmul.f32 %v404_v22, %v392_v19 }
 0x16a   : > { %v396_v26 = vpop.f32.mrf.mxu3 }
 0x16b   : > { %v417_v27 = vadd.f32 %v413_v24, %v395_v14  ;;  %v412_v28 = vmul.f32 %v408_v25, %v392_v19  ;;  %v397_v29 = vadd.f32 %v396_v26, %v362_v23 }
 0x16d   : > { %v421_v30 = vmul.f32 0.7978846, %v417_v27  ;;  %v416_v31 = vadd.f32 %v412_v28, %v392_v19  ;;  %v406_v32 = vmul.f32 0.044715, %v397_v29  ;;  %v402_v53 = vmul.f32 0.5, %v397_v29 }
 0x16f   : > { %v691_v33 = vpop.eup %690  ;;  %692 = vtanh.f32 %v421_v30  ;;  %v420_v34 = vmul.f32 0.7978846, %v416_v31  ;;  %v410_v35 = vmul.f32 %v406_v32, %v397_v29 }
 0x170   : > { %v427_v37 = vadd.f32 1.0, %v691_v33 }
 0x171   : > { %694 = vtanh.f32 %v420_v34  ;;  %v414_v38 = vmul.f32 %v410_v35, %v397_v29 }
 0x172   : > { %v431_v39 = vmul.f32 %v427_v37, %v399_v36 }
 0x173   : > { %v418_v40 = vadd.f32 %v414_v38, %v397_v29 }
 0x174   : > { %v435_v41 = vadd.f32 %v431_v39, %v965_v3 }
 0x175   : > { %v693_v42 = vpop.eup %692  ;;  %v422_v43 = vmul.f32 0.7978846, %v418_v40 }
 0x176   : > { %439 = vst [vmem:[%s234_s9] sm:$0xff] %v435_v41  ;;  %v429_v45 = vadd.f32 1.0, %v693_v42 }
 0x177   : > { %v695_v46 = vpop.eup %694  ;;  %696 = vtanh.f32 %v422_v43 }
 0x178   : > { %v433_v47 = vmul.f32 %v429_v45, %v401_v44  ;;  %v428_v49 = vadd.f32 1.0, %v695_v46 }
 0x17a   : > { %v437_v50 = vadd.f32 %v433_v47, %v961_v1  ;;  %v432_v51 = vmul.f32 %v428_v49, %v400_v48 }
 0x17c   : > { %441 = vst [vmem:[%s234_s9 + $0x10] sm:$0xff] %v437_v50  ;;  %v436_v3 = vadd.f32 %v432_v51, %v969_v5 }
 0x17d   : > { %v697_v52 = vpop.eup %696 }
 0x17e   : > { %440 = vst [vmem:[%s234_s9 + $0x8] sm:$0xff] %v436_v3  ;;  %v430_v54 = vadd.f32 1.0, %v697_v52 }
 0x180   : > { %v434_v55 = vmul.f32 %v430_v54, %v402_v53 }
 0x182   : > { %v438_v1 = vadd.f32 %v434_v55, %v963_v2 }
 0x184   : > { %442 = vst [vmem:[%s234_s9 + $0x18] sm:$0xff] %v438_v1 }
 0x185   : > { %755 = shalt.err (!%p752_p11)
}
 0x186   : > { %s833_s11 = smov 128   ;;  %s834_s17 = smov 256  }
 0x187   : > { %s835_s25 = smov 8  }
 0x188   : > { %593 = dma.vmem_to_hbm [thread:$0]  (%p926_p9), %s458_s18, 512, %s460_s26, %s444_s23, %s833_s11, %s834_s17, %s835_s25  }
 0x189 PF: > { %p604_p13 = scmp.ge.s32.totalorder %s826_s22, 2  ;;  %s474_s30 = sand.u32 1, %s798_s15  }
 0x18a   : > { %s475_s9 = scalar_lea.sflag [#allocation4], %s474_s30 }
 0x18b   : > { %p600_p0 = pnand %p604_p13, %p932_p12 }
 0x18d   : > { %p601_p1 = pneg %p600_p0 }
 0x18f   : > { %793 = dma.done.wait (%p601_p1), %s475_s9, 512  }
 0x190   : > { %795 = vsyncadd (%p601_p1), %s475_s9, 4294966784  ;;  %s20_s22 = sadd.s32 1, %s826_s22   ;;  %s1067_s10 = sld [smem:[#allocation8_spill]] }
 0x191   : > { %p17_p2 = scmp.ge.s32.totalorder %s20_s22, 6   ;;  %s1068_s17 = sld [smem:[#allocation11_spill]] }
 0x192   : > { %s1069_s5 = sld [smem:[#allocation9_spill]]  ;;  %s1071_s15 = smov %s802_s16 }
 0x193   : > { %s1070_s13 = sld [smem:[#allocation10_spill]]  ;;  %s1073_s18 = smov %s818_s20 }
 0x194   : > { %s1074_s19 = smov %s822_s21 }
 0x195   :  { %19 = sbr.rel (!%p17_p2) target bundleno = 7 (0x7), region = 81 }
 0x196   : > { %s1072_s16 = smov %s1067_s10 }
 0x198   : > { %s1075_s20 = smov %s1069_s5 }
 0x199   : > { %s1076_s21 = smov %s1070_s13 }
 0x19a   :  { %481 = vsyncpa [#allocation3], 1 }
 0x19b   :  { %483 = vsyncpa [#allocation3 + $0x1], 1 }
 0x19c   :  { %484 = vsyncpa [#allocation4], 1 }
 0x19d   :  { %486 = vsyncpa [#allocation4 + $0x1], 1 }

</bundles_post_ra>
